<compile_context>
chip_gen: v7x
topology: tpu7x:2x2x1
jax: 0.10.0
libtpu: 0.0.40
codegen_flags: <defaults>
</compile_context>

<pallas_src>
import functools

import jax
import jax.numpy as jnp
from jax.experimental import pallas as pl
from jax.experimental.pallas import tpu as pltpu


# ---------------------------------------------------------------------------
# Synthetic metadata (deterministic, in-script): variable order decides blocks.
#   3 binary vars    -> block "sigmoid"   size 3
#   2 numerical      -> block "identity"  size 2
#   1 categorical(5) -> block "softmax"   size 5
#   2 binary vars    -> block "sigmoid"   size 2
# ---------------------------------------------------------------------------
SEGMENTS = (
    ("sigmoid", 3),
    ("identity", 2),
    ("softmax", 5),
    ("sigmoid", 2),
)
D_TOTAL = sum(s for _, s in SEGMENTS)

LANE = 128
SUBLANE = 8


def _round_up(n, m):
    return ((n + m - 1) // m) * m


def multi_output_kernel(x_ref, w_ref, b_ref, o_ref, *, segments, d_out, d_pad):
    """Fused: y = x @ W + b (bf16 operands, f32 acc), masked per-segment activations,
    narrow store of the live d_out columns."""
    x = x_ref[...]                                       # [TB, H] f32
    w = w_ref[...]                                       # [H, D_pad] bf16 (zero lane-pad)
    b = b_ref[...]                                       # [1, D_pad] f32
    y = jnp.dot(x.astype(w.dtype), w,
                preferred_element_type=jnp.float32) + b  # [TB, D_pad] f32

    # Static lane-index row; all masks below have trace-time-constant shapes.
    lane = jax.lax.broadcasted_iota(jnp.int32, (1, d_pad), 1)

    # --- sigmoid (binary) blocks: one full-width masked select, no slices ----
    sig_mask = jnp.zeros((1, d_pad), dtype=jnp.bool_)
    start = 0
    for kind, size in segments:      # static Python loop, unrolled at trace time
        if kind == "sigmoid":
            sig_mask = sig_mask | ((lane >= start) & (lane < start + size))
        start += size
    out = jnp.where(sig_mask, jax.nn.sigmoid(y), y)

    # --- softmax (categorical) blocks: masked softmax at full lane width -----
    start = 0
    for kind, size in segments:
        if kind == "softmax":
            m = (lane >= start) & (lane < start + size)
            mx = jnp.max(jnp.where(m, y, -jnp.inf), axis=-1, keepdims=True)
            # NOTE: keep the where-select (not a multiply-by-mask) to avoid inf*0=NaN.
            e = jnp.where(m, jnp.exp(y - mx), 0.0)
            denom = jnp.sum(e, axis=-1, keepdims=True)
            out = jnp.where(m, e * pl.reciprocal(denom, approx=True), out)
        start += size

    # Identity (numerical) blocks keep the raw linear output.
    # Store only the live D columns -> narrow HBM writeback (no padded slab).
    o_ref[...] = out[:, :d_out].astype(o_ref.dtype)


def multi_output_layer(x, w, b, *, segments=SEGMENTS, tb=None,
                       matmul_dtype=jnp.bfloat16):
    """x: [B, H] f32, w: [H, D_total], b: [D_total] -> [B, D_total] f32."""
    B, H = x.shape
    D = w.shape[1]
    d_pad = _round_up(max(D, LANE), LANE)

    # Lane-pad the fused weight (bf16, resident in VMEM: only H*d_pad*2 bytes) and bias.
    w_p = jnp.zeros((H, d_pad), matmul_dtype).at[:, :D].set(w.astype(matmul_dtype))
    b_p = jnp.zeros((1, d_pad), jnp.float32).at[0, :D].set(
        b.reshape(-1).astype(jnp.float32))

    # Batch tile: multiple of 8 sublanes, aim for >= ~4 grid steps so the pipeline has
    # work to overlap and both v7x TensorCores get iterations; cap at 4096 rows
    # (x tile 4096*H*4B double-buffered + out tile 4096*D*4B << scoped VMEM on all gens).
    if tb is None:
        tb = min(4096, max(SUBLANE, _round_up(pl.cdiv(B, 4), SUBLANE)))
    else:
        tb = max(SUBLANE, _round_up(tb, SUBLANE))

    grid = (pl.cdiv(B, tb),)   # ragged last block handled by Pallas (no wrapper pad)
    kernel = functools.partial(multi_output_kernel, segments=segments,
                               d_out=D, d_pad=d_pad)

    out = pl.pallas_call(
        kernel,
        out_shape=jax.ShapeDtypeStruct((B, D), x.dtype),
        grid=grid,
        in_specs=[
            pl.BlockSpec((tb, H), lambda i: (i, 0)),        # batch-tiled activations
            pl.BlockSpec((H, d_pad), lambda i: (0, 0)),     # weights stay resident
            pl.BlockSpec((1, d_pad), lambda i: (0, 0)),     # bias stays resident
        ],
        out_specs=pl.BlockSpec((tb, D), lambda i: (i, 0)),  # narrow, last dim == D
        compiler_params=pltpu.CompilerParams(
            dimension_semantics=("parallel",)),
        cost_estimate=pl.CostEstimate(
            flops=2 * B * H * d_pad,
            transcendentals=3 * B * d_pad,                  # sigmoid + exp + reciprocal
            bytes_accessed=4 * B * H + 2 * H * d_pad + 4 * d_pad + 4 * B * D),
    )(x, w_p, b_p)
    return out


def reference(x, w, b, segments=SEGMENTS):
    y = x @ w + b
    outs, start = [], 0
    for kind, size in segments:
        seg = y[:, start:start + size]
        if kind == "sigmoid":
            seg = jax.nn.sigmoid(seg)
        elif kind == "softmax":
            seg = jax.nn.softmax(seg, axis=-1)
        outs.append(seg)
        start += size
    return jnp.concatenate(outs, axis=-1)


if __name__ == "__main__":
    H = 32  # input_size

    key = jax.random.PRNGKey(0)
    kx, kw, kb, kx2 = jax.random.split(key, 4)

    # Per-block Linear params (weight [in, out], bias [out]), concatenated along out dim.
    bound = 1.0 / (H ** 0.5)
    w = jax.random.uniform(kw, (H, D_TOTAL), minval=-bound, maxval=bound,
                           dtype=jnp.float32)
    bvec = jax.random.uniform(kb, (D_TOTAL,), minval=-bound, maxval=bound,
                              dtype=jnp.float32)

    # Tolerances absorb the bf16 MXU operand cast (acc stays f32) + approx reciprocal.
    ATOL = RTOL = 2e-2

    # Case 1: tiny batch (single grid step).
    B1 = 8
    x1 = jax.random.normal(kx, (B1, H), dtype=jnp.float32)
    out1 = jax.block_until_ready(multi_output_layer(x1, w, bvec))
    ref1 = reference(x1, w, bvec)
    assert out1.shape == (B1, D_TOTAL)
    assert jnp.allclose(out1, ref1, atol=ATOL, rtol=RTOL), "mismatch vs reference (B=8)"

    # Case 2: batch not a multiple of the tile -> exercises ragged last grid block.
    B2 = 40
    x2 = jax.random.normal(kx2, (B2, H), dtype=jnp.float32)
    out2 = jax.block_until_ready(multi_output_layer(x2, w, bvec, tb=16))
    ref2 = reference(x2, w, bvec)
    assert out2.shape == (B2, D_TOTAL)
    assert jnp.allclose(out2, ref2, atol=ATOL, rtol=RTOL), "mismatch vs reference (B=40)"

    print("KERNEL_OK")
</pallas_src>

<mosaic_0001>
module attributes {stable_mosaic.version = 11 : i64} {
  func.func @multi_output_kernel(%arg0: i32, %arg1: memref<8x32xf32, #tpu.memory_space<vmem>>, %arg2: memref<32x128xbf16, #tpu.memory_space<vmem>>, %arg3: memref<1x128xf32, #tpu.memory_space<vmem>>, %arg4: memref<8x12xf32, #tpu.memory_space<vmem>>) attributes {dimension_semantics = [#tpu.dimension_semantics<parallel>], iteration_bounds = array<i64: 1>, scalar_prefetch = 0 : i64, scratch_operands = 0 : i64, tpu.core_type = #tpu.core_type<tc>, window_params = [{transform_indices = @transform_0, window_bounds = array<i64: 8, 32>}, {pipeline_mode = #tpu.pipeline_mode<synchronous>, transform_indices = @transform_1, window_bounds = array<i64: 32, 128>}, {pipeline_mode = #tpu.pipeline_mode<synchronous>, transform_indices = @transform_2, window_bounds = array<i64: 1, 128>}, {transform_indices = @transform_3, window_bounds = array<i64: 8, 12>}]} {
    %c0 = arith.constant 0 : index
    %c0_0 = arith.constant 0 : index
    %0 = vector.load %arg1[%c0, %c0_0] : memref<8x32xf32, #tpu.memory_space<vmem>>, vector<8x32xf32>
    %c0_1 = arith.constant 0 : index
    %c0_2 = arith.constant 0 : index
    %1 = vector.load %arg2[%c0_1, %c0_2] : memref<32x128xbf16, #tpu.memory_space<vmem>>, vector<32x128xbf16>
    %c0_3 = arith.constant 0 : index
    %c0_4 = arith.constant 0 : index
    %2 = vector.load %arg3[%c0_3, %c0_4] : memref<1x128xf32, #tpu.memory_space<vmem>>, vector<1x128xf32>
    %3 = arith.truncf %0 : vector<8x32xf32> to vector<8x32xbf16>
    %cst = arith.constant dense<0.000000e+00> : vector<8x128xf32>
    %4 = tpu.matmul %3, %1, %cst {dimension_numbers = #tpu.dot_dimension_numbers<[1], [0], [0], [1], [0, 0, 1, 1], [], []>} : vector<8x32xbf16>, vector<32x128xbf16>, vector<8x128xf32> -> vector<8x128xf32>
    %5 = vector.broadcast %2 : vector<1x128xf32> to vector<8x128xf32>
    %6 = arith.addf %4, %5 : vector<8x128xf32>
    %7 = tpu.iota {dimensions = array<i32: 1>} : vector<1x128xi32>
    %false = arith.constant false
    %8 = vector.broadcast %false : i1 to vector<1x128xi1>
    %c0_i32 = arith.constant 0 : i32
    %9 = vector.broadcast %c0_i32 : i32 to vector<1x128xi32>
    %10 = arith.cmpi sge, %7, %9 : vector<1x128xi32>
    %c3_i32 = arith.constant 3 : i32
    %11 = vector.broadcast %c3_i32 : i32 to vector<1x128xi32>
    %12 = arith.cmpi slt, %7, %11 : vector<1x128xi32>
    %13 = arith.andi %10, %12 : vector<1x128xi1>
    %14 = arith.ori %8, %13 : vector<1x128xi1>
    %c10_i32 = arith.constant 10 : i32
    %15 = vector.broadcast %c10_i32 : i32 to vector<1x128xi32>
    %16 = arith.cmpi sge, %7, %15 : vector<1x128xi32>
    %c12_i32 = arith.constant 12 : i32
    %17 = vector.broadcast %c12_i32 : i32 to vector<1x128xi32>
    %18 = arith.cmpi slt, %7, %17 : vector<1x128xi32>
    %19 = arith.andi %16, %18 : vector<1x128xi1>
    %20 = arith.ori %14, %19 : vector<1x128xi1>
    %21 = arith.negf %6 : vector<8x128xf32>
    %22 = math.exp %21 : vector<8x128xf32>
    %cst_5 = arith.constant 1.000000e+00 : f32
    %23 = vector.broadcast %cst_5 : f32 to vector<8x128xf32>
    %24 = arith.addf %23, %22 : vector<8x128xf32>
    %25 = arith.divf %23, %24 : vector<8x128xf32>
    %26 = vector.shape_cast %20 : vector<1x128xi1> to vector<1x128xi1>
    %27 = vector.broadcast %26 : vector<1x128xi1> to vector<8x128xi1>
    %28 = arith.select %27, %25, %6 : vector<8x128xi1>, vector<8x128xf32>
    %c5_i32 = arith.constant 5 : i32
    %29 = vector.broadcast %c5_i32 : i32 to vector<1x128xi32>
    %30 = arith.cmpi sge, %7, %29 : vector<1x128xi32>
    %c10_i32_6 = arith.constant 10 : i32
    %31 = vector.broadcast %c10_i32_6 : i32 to vector<1x128xi32>
    %32 = arith.cmpi slt, %7, %31 : vector<1x128xi32>
    %33 = arith.andi %30, %32 : vector<1x128xi1>
    %cst_7 = arith.constant 0xFF800000 : f32
    %34 = vector.shape_cast %33 : vector<1x128xi1> to vector<1x128xi1>
    %35 = vector.broadcast %34 : vector<1x128xi1> to vector<8x128xi1>
    %36 = vector.broadcast %cst_7 : f32 to vector<8x128xf32>
    %37 = arith.select %35, %6, %36 : vector<8x128xi1>, vector<8x128xf32>
    %cst_8 = arith.constant dense<0xFF800000> : vector<8xf32>
    %38 = vector.multi_reduction <maximumf>, %37, %cst_8 [1] : vector<8x128xf32> to vector<8xf32>
    %39 = vector.shape_cast %38 : vector<8xf32> to vector<8x1xf32>
    %40 = vector.broadcast %39 : vector<8x1xf32> to vector<8x128xf32>
    %41 = arith.subf %6, %40 : vector<8x128xf32>
    %42 = math.exp %41 : vector<8x128xf32>
    %cst_9 = arith.constant 0.000000e+00 : f32
    %43 = vector.shape_cast %33 : vector<1x128xi1> to vector<1x128xi1>
    %44 = vector.broadcast %43 : vector<1x128xi1> to vector<8x128xi1>
    %45 = vector.broadcast %cst_9 : f32 to vector<8x128xf32>
    %46 = arith.select %44, %42, %45 : vector<8x128xi1>, vector<8x128xf32>
    %cst_10 = arith.constant dense<0.000000e+00> : vector<8xf32>
    %47 = vector.multi_reduction <add>, %46, %cst_10 [1] : vector<8x128xf32> to vector<8xf32>
    %48 = vector.shape_cast %47 : vector<8xf32> to vector<8x1xf32>
    %49 = tpu.reciprocal %48 {approx = true} : vector<8x1xf32> -> vector<8x1xf32>
    %50 = vector.broadcast %49 : vector<8x1xf32> to vector<8x128xf32>
    %51 = arith.mulf %46, %50 : vector<8x128xf32>
    %52 = vector.shape_cast %33 : vector<1x128xi1> to vector<1x128xi1>
    %53 = vector.broadcast %52 : vector<1x128xi1> to vector<8x128xi1>
    %54 = arith.select %53, %51, %28 : vector<8x128xi1>, vector<8x128xf32>
    %55 = vector.extract_strided_slice %54 {offsets = [0, 0], sizes = [8, 12], strides = [1, 1]} : vector<8x128xf32> to vector<8x12xf32>
    %c0_11 = arith.constant 0 : index
    %c0_12 = arith.constant 0 : index
    %56 = vector.load %arg4[%c0_11, %c0_12] : memref<8x12xf32, #tpu.memory_space<vmem>>, vector<8x12xf32>
    tpu.vector_store %arg4[%c0_11, %c0_12], %55 {strides = array<i32>} : memref<8x12xf32, #tpu.memory_space<vmem>>, vector<8x12xf32>,
    return
  }
  func.func @transform_0(%arg0: i32) -> (i32, i32) {
    %c0_i32 = arith.constant 0 : i32
    %c0_i32_0 = arith.constant 0 : i32
    return %arg0, %c0_i32 : i32, i32
  }
  func.func @transform_1(%arg0: i32) -> (i32, i32) {
    %c0_i32 = arith.constant 0 : i32
    %c0_i32_0 = arith.constant 0 : i32
    %c0_i32_1 = arith.constant 0 : i32
    return %c0_i32, %c0_i32_0 : i32, i32
  }
  func.func @transform_2(%arg0: i32) -> (i32, i32) {
    %c0_i32 = arith.constant 0 : i32
    %c0_i32_0 = arith.constant 0 : i32
    %c0_i32_1 = arith.constant 0 : i32
    return %c0_i32, %c0_i32_0 : i32, i32
  }
  func.func @transform_3(%arg0: i32) -> (i32, i32) {
    %c0_i32 = arith.constant 0 : i32
    %c0_i32_0 = arith.constant 0 : i32
    return %arg0, %c0_i32 : i32, i32
  }
}

</mosaic_0001>

<bundles_post_ra>
// kernel: tpu_custom_call.1
= control target key start
LH: loop header
LB: loop body
LE: loop exit
PB: predicated region body
PF: predicated region fallthrough
CT: control target
= control target key end

     0   :  { %8 = vsyncpa [#allocation3], 0  ;;  %s352_s0 = inlined_call_operand.hbm [shape: f32[8,32], index: 0, kind: input, shape index: {}]   ;;  %s353_s1 = inlined_call_operand.hbm [shape: bf16[32,128], index: 1, kind: input, shape index: {}]   ;;  %s354_s2 = inlined_call_operand.vmem [shape: f32[1,128], index: 2, kind: input, shape index: {}]   ;;  %s355_s3 = inlined_call_operand.hbm [shape: f32[8,12], index: 3, kind: output, shape index: {}]  }
   0x1   :  { %9 = vsyncpa [#allocation6], 0 }
   0x2   :  { %10 = vsyncpa [#allocation4], 0  ;;  %s269_s12 = smov [#allocation2]   ;;  %s270_s14 = smov [#allocation5]  }
   0x3   :  { %s17_s13 = sshll.u32 %s269_s12, 4  ;;  %s26_s15 = sshll.u32 %s270_s14, 4  ;;  %s18_s13 = int_to_ptr.vmem [resolvable:$true] %s17_s13  ;;  %s296_s15 = int_to_ptr.vmem [resolvable:$true] %s26_s15 }
   0x4   :  { %s197_s18 = scalar_lea.hbm %s352_s0, 128 }
   0x5   :  { %p198_p0 = scmp.ne.s32.totalorder %s352_s0, %s197_s18  ;;  %p201_p1 = scmp.lt.u32.totalorder %s197_s18, %s352_s0 }
   0x7   :  { %p203_p2 = pnand %p201_p1, %p198_p0 }
   0x9   :  { %206 = shalt.err (!%p203_p2)
}
   0xa   :  { %s207_s23 = scalar_lea.vmem %s18_s13, 128  ;;  %p212_p4 = scmp.lt.s32.totalorder %s18_s13, %s18_s13 }
   0xb   :  { %p208_p3 = scmp.ne.s32.totalorder %s18_s13, %s207_s23  ;;  %p213_p5 = scmp.lt.s32.totalorder %s207_s23, %s207_s23 }
   0xd   :  { %p214_p6 = por %p213_p5, %p212_p4 }
   0xf   :  { %p215_p7 = pnand %p214_p6, %p208_p3 }
  0x11   :  { %218 = shalt.err (!%p215_p7)
}
  0x12   :  { %20 = dma.hbm_to_vmem [thread:$0]  %s352_s0, 128, %s18_s13, [#allocation3]  }
  0x13   :  { %s219_s28 = scalar_lea.hbm %s353_s1, 256 }
  0x14   :  { %p220_p8 = scmp.ne.s32.totalorder %s353_s1, %s219_s28  ;;  %p223_p9 = scmp.lt.u32.totalorder %s219_s28, %s353_s1 }
  0x16   :  { %p225_p10 = pnand %p223_p9, %p220_p8 }
  0x18   :  { %228 = shalt.err (!%p225_p10)
}
  0x19   :  { %s229_s6 = scalar_lea.vmem %s296_s15, 256  ;;  %p234_p12 = scmp.lt.s32.totalorder %s296_s15, %s296_s15 }
  0x1a   :  { %p230_p11 = scmp.ne.s32.totalorder %s296_s15, %s229_s6  ;;  %p235_p13 = scmp.lt.s32.totalorder %s229_s6, %s229_s6 }
  0x1c   :  { %p236_p0 = por %p235_p13, %p234_p12 }
  0x1e   :  { %p237_p1 = pnand %p236_p0, %p230_p11 }
  0x20   :  { %240 = shalt.err (!%p237_p1)
}
  0x21   :  { %s271_s0 = smov 64   ;;  %s272_s7 = smov 4  }
  0x22   :  { %32 = dma.hbm_to_vmem [thread:$0]  %s353_s1, 256, %s296_s15, [#allocation6], %s271_s0, %s271_s0, %s272_s7  }
  0x23   :  { %263 = dma.done.wait [#allocation3], 128  }
  0x24   :  { %264 = vsyncadd [#allocation3], 4294967168 }
  0x25   :  { %265 = dma.done.wait [#allocation6], 256  }
  0x26   :  { %266 = vsyncadd [#allocation6], 4294967040  ;;  %v273_v0 = vmov 0.0   ;;  %vm274_vm0 = vmmov 0   ;;  %v187_v1 = vld [vmem:[#allocation5] sm:$0xff]   ;;  %v188_v2 = vld [vmem:[#allocation5 + $0x8] sm:$0xff]   ;;  %v111_v5 = vlaneseq }
  0x27   :  { %172 = vmatprep.subr.bf16.mxu0 %v273_v0  ;;  %176 = vmatprep.mubr.msk.bf16.mxu0 %vm274_vm0, %v273_v0  ;;  %v42_v3 = vld [vmem:[#allocation2] sm:$0xff]  ;;  %vm67_vm1 = vcmask 261120   ;;  %vm146_vm10 = vcmask 97280  }
  0x28   :  { %173 = vmatpush3.bf16.msra.mxu0 %v187_v1  ;;  %v48_v4 = vpack.c.bf16 %v42_v3, %v42_v3  ;;  %v112_v6 = vand.u32 127, %v111_v5  ;;  %v164_v7 = vld [vmem:[%s354_s2] ss:$0 sm:$0xff]  ;;  %s275_s2 = smov [#allocation7]  }
  0x29   :  { %174 = vmatprep.subr.bf16.mxu0 %v273_v0  ;;  %s154_s11 = sshll.u32 %s275_s2, 4  ;;  %s155_s11 = int_to_ptr.vmem [resolvable:$true] %s154_s11 }
  0x2a   :  { %vm129_vm2 = vcmp.ge.s32.totalorder %v112_v6, 5  ;;  %vm130_vm3 = vcmp.lt.s32.totalorder %v112_v6, 10  ;;  %vm116_vm5 = vcmp.ge.s32.totalorder %v112_v6, 10  ;;  %vm117_vm6 = vcmp.lt.s32.totalorder %v112_v6, 12  ;;  %s241_s12 = scalar_lea.vmem %s155_s11, 128  ;;  %p246_p3 = scmp.lt.s32.totalorder %s155_s11, %s155_s11 }
  0x2b   :  { %vm330_vm4 = vmand %vm129_vm2, %vm130_vm3  ;;  %vm114_vm7 = vcmp.lt.s32.totalorder %v112_v6, 3  ;;  %p242_p2 = scmp.ne.s32.totalorder %s155_s11, %s241_s12  ;;  %p247_p4 = scmp.lt.s32.totalorder %s241_s12, %s241_s12 }
  0x2c   :  { %175 = vmatpush3.bf16.msra.mxu0 %v188_v2  ;;  %vm118_vm8 = vmand %vm116_vm5, %vm117_vm6 }
  0x2d   :  { %vm119_vm9 = vmor %vm114_vm7, %vm118_vm8  ;;  %p248_p5 = por %p247_p4, %p246_p3 }
  0x2f   :  { %177 = vmatmul.mubr.msk.bf16.vlgmr.msra.gmra.mrb[0].mxu0 %vm67_vm1, %v48_v4  ;;  %p249_p6 = pnand %p248_p5, %p242_p2 }
 0x102   :  { %v105_v8 = vpop.f32.mrb[0].mxu0 }
 0x103   :  { %v106_v10 = vadd.f32 %v164_v7, %v105_v8  ;;  %v178_v11 = vpop.f32.mrb[1].mxu0 }
 0x104   :  { %v108_v12 = vpop.f32.mrb[2].mxu0 }
 0x105   :  { %v179_v13 = vpop.f32.mrb[3].mxu0  ;;  %v134_v14 = vsel %vm330_vm4, %v106_v10, -inf  ;;  %v168_v20 = vmul.f32 -1.442695, %v106_v10 }
 0x106   :  { %135 = vmax.xlane.f32.xlu0 %v134_v14 }
 0x193   :  { %v136_v15 = vpop.xlane.xlu0 %135 }
 0x194   :  { %v137_v16 = vsub.f32 %v106_v10, %v136_v15 }
 0x196   :  { %v138_v17 = vmul.f32 1.442695, %v137_v16 }
 0x198   :  { %189 = vpow2.f32 %v138_v17 }
 0x199   :  { %191 = vpow2.f32 %v168_v20 }
 0x1a2   :  { %v190_v18 = vpop.eup %189 }
 0x1a3   :  { %v140_v19 = vsel %vm330_vm4, %v190_v18, 0.0  ;;  %v192_v21 = vpop.eup %191 }
 0x1a4   :  { %141 = vadd.xlane.f32.xlu0 %v140_v19  ;;  %v123_v22 = vadd.f32 1.0, %v192_v21 }
 0x1a6   :  { %193 = vrcp.f32 %v123_v22 }
 0x1b0   :  { %v194_v24 = vpop.eup %193 }
 0x1b1   :  { %v128_v27 = vsel %vm119_vm9, %v194_v24, %v106_v10 }
 0x231   :  { %v142_v23 = vpop.xlane.xlu0 %141 }
 0x232   :  { %195 = vrcp.f32 %v142_v23 }
 0x23c   :  { %v196_v25 = vpop.eup %195 }
 0x23d   :  { %v144_v26 = vmul.f32 %v196_v25, %v140_v19 }
 0x23f   :  { %v145_v28 = vsel %vm330_vm4, %v144_v26, %v128_v27 }
 0x240   :  { %147 = vst.msk [vmem:[#allocation7] sm:$0xff] %vm146_vm10, %v145_v28 }
 0x241   :  { %252 = shalt.err (!%p249_p6)
}
 0x242   :  { %s253_s15 = scalar_lea.hbm %s355_s3, 128 }
 0x243   :  { %p254_p7 = scmp.ne.s32.totalorder %s355_s3, %s253_s15  ;;  %p257_p8 = scmp.lt.u32.totalorder %s253_s15, %s355_s3 }
 0x245   :  { %p259_p9 = pnand %p257_p8, %p254_p7 }
 0x247   :  { %262 = shalt.err (!%p259_p9)
}
 0x248   :  { %157 = dma.vmem_to_hbm [thread:$0]  %s155_s11, 128, %s355_s3, [#allocation4]  }
 0x249   :  { %267 = dma.done.wait [#allocation4], 128  }
 0x24a   :  { %268 = vsyncadd [#allocation4], 4294967168 }
 0x24b   :  { %161 = vsyncpa [#allocation3], 1 }
 0x24c   :  { %162 = vsyncpa [#allocation6], 1 }
 0x24d   :  { %163 = vsyncpa [#allocation4], 1 }

</bundles_post_ra>
